<compile_context>
chip_gen: v7x
topology: tpu7x:2x2x1
jax: 0.10.0
libtpu: 0.0.40
codegen_flags: <defaults>
</compile_context>

<pallas_src>
import functools
import math

import jax
import jax.numpy as jnp
import numpy as np
from jax import lax
from jax.experimental import pallas as pl
from jax.experimental.pallas import tpu as pltpu


def _round_up(x, m):
    return (x + m - 1) // m * m


def _pcloss_kernel(featq_ref, featk_ref, proxy_ref, tgtq_ref, tgtk_ref,
                   loss_ref, qn_ref, m_ref, l_ref, a_ref,
                   *, scale, compute_dtype):
    j = pl.program_id(1)
    s = jnp.float32(scale)
    neg_inf = jnp.float32(-jnp.inf)
    dn = (((1,), (1,)), ((), ()))              # contract on the feature (last) dim

    tgt_q = tgtq_ref[...]                      # (TQ, 1) int32

    @pl.when(j == 0)
    def _init():
        # Normalize the query tile once per row block (f32), cache in compute dtype.
        q = featq_ref[...].astype(jnp.float32)
        qn = q * lax.rsqrt(jnp.maximum(jnp.sum(q * q, axis=1, keepdims=True), 1e-24))
        qn_ref[...] = qn.astype(compute_dtype)

        # Proxy logits for this row block: pred = scale * <fn, pn>   -> (TQ, C)
        p = proxy_ref[...].astype(jnp.float32)
        pn = p * lax.rsqrt(jnp.maximum(jnp.sum(p * p, axis=1, keepdims=True), 1e-24))
        pred = s * lax.dot_general(qn.astype(compute_dtype), pn.astype(compute_dtype),
                                   dn, preferred_element_type=jnp.float32)

        # One-hot of target built in-kernel from iota (no (N, C) one-hot input).
        cls = lax.broadcasted_iota(jnp.int32, pred.shape, 1)
        is_pos = cls == tgt_q                                               # (TQ, C)

        a = jnp.sum(jnp.where(is_pos, pred, 0.0), axis=1, keepdims=True)    # positive
        neg_max = jnp.max(jnp.where(is_pos, neg_inf, pred), axis=1, keepdims=True)
        m0 = jnp.maximum(a, neg_max)                                        # always finite
        l0 = (jnp.exp(a - m0)
              + jnp.sum(jnp.where(is_pos, 0.0, jnp.exp(pred - m0)),
                        axis=1, keepdims=True))
        a_ref[...] = a
        m_ref[...] = m0
        l_ref[...] = l0

    # Every j: streamed key tile -> masked feature-feature similarities, online LSE.
    k = featk_ref[...].astype(jnp.float32)
    kn = (k * lax.rsqrt(jnp.maximum(jnp.sum(k * k, axis=1, keepdims=True), 1e-24))
          ).astype(compute_dtype)
    sim = lax.dot_general(qn_ref[...], kn, dn,
                          preferred_element_type=jnp.float32)               # (TQ, TK) f32

    same = tgt_q == tgtk_ref[...]                                           # (TQ, TK)
    keep = jnp.logical_and(jnp.logical_not(same), sim >= 1e-6)
    scaled = s * sim

    blk_max = jnp.max(jnp.where(keep, scaled, neg_inf), axis=1, keepdims=True)
    m_old = m_ref[...]
    m_new = jnp.maximum(m_old, blk_max)                                     # stays finite
    contrib = jnp.sum(jnp.where(keep, jnp.exp(scaled - m_new), 0.0),
                      axis=1, keepdims=True)
    l_ref[...] = jnp.exp(m_old - m_new) * l_ref[...] + contrib
    m_ref[...] = m_new

    @pl.when(j == pl.num_programs(1) - 1)
    def _finalize():
        # per-row loss = logsumexp(scaled logits) - scaled positive logit
        loss_ref[...] = m_ref[...] + jnp.log(l_ref[...]) - a_ref[...]


def pc_loss_pallas(feature, target, proxy, num_classes, scale, *,
                   block_q=128, block_k=512, compute_dtype=jnp.bfloat16):
    N, D = feature.shape
    C, D2 = proxy.shape
    assert D == D2 and C == num_classes

    tq = _round_up(min(block_q, _round_up(N, 8)), 8)
    tk = _round_up(min(block_k, _round_up(N, 128)), 128)
    n_pad = _round_up(N, math.lcm(tq, tk))

    tgt = target.astype(jnp.int32)
    feat = feature
    if n_pad != N:
        feat = jnp.pad(feature, ((0, n_pad - N), (0, 0)))
        tgt = jnp.pad(tgt, (0, n_pad - N))
    tgt_col = tgt.reshape(n_pad, 1)
    tgt_row = tgt.reshape(1, n_pad)

    grid = (n_pad // tq, n_pad // tk)
    kernel = functools.partial(_pcloss_kernel, scale=float(scale),
                               compute_dtype=compute_dtype)

    per_row = pl.pallas_call(
        kernel,
        out_shape=jax.ShapeDtypeStruct((n_pad, 1), jnp.float32),
        grid_spec=pltpu.PrefetchScalarGridSpec(
            num_scalar_prefetch=0,
            grid=grid,
            in_specs=[
                pl.BlockSpec((tq, D), lambda i, j: (i, 0)),    # query feature tile
                pl.BlockSpec((tk, D), lambda i, j: (j, 0)),    # key   feature tile
                pl.BlockSpec((C, D), lambda i, j: (0, 0)),     # proxies (resident)
                pl.BlockSpec((tq, 1), lambda i, j: (i, 0)),    # target (column layout)
                pl.BlockSpec((1, tk), lambda i, j: (0, j)),    # target (row layout)
            ],
            out_specs=pl.BlockSpec((tq, 1), lambda i, j: (i, 0)),
            scratch_shapes=[
                pltpu.VMEM((tq, D), compute_dtype),            # normalized query tile
                pltpu.VMEM((tq, 1), jnp.float32),              # running max m
                pltpu.VMEM((tq, 1), jnp.float32),              # running denom l
                pltpu.VMEM((tq, 1), jnp.float32),              # scaled positive logit
            ],
        ),
        compiler_params=pltpu.CompilerParams(
            dimension_semantics=("parallel", "arbitrary")),
    )(feat, feat, proxy, tgt_col, tgt_row)

    return jnp.sum(per_row[:N, 0]) / jnp.float32(N)


def pc_loss_ref(feature, target, proxy, scale, matmul_dtype=jnp.float32):
    """Pure-JAX reference mirroring the PyTorch forward (optionally bf16 matmul inputs)."""
    fn = feature / jnp.maximum(jnp.linalg.norm(feature, axis=1, keepdims=True), 1e-12)
    pn = proxy / jnp.maximum(jnp.linalg.norm(proxy, axis=1, keepdims=True), 1e-12)
    fnc = fn.astype(matmul_dtype).astype(jnp.float32)
    pnc = pn.astype(matmul_dtype).astype(jnp.float32)
    pred = fnc @ pnc.T                                           # (N, C)
    num_classes = proxy.shape[0]
    mask = jnp.arange(num_classes)[None, :] == target[:, None]   # label.T
    pred_p = jnp.sum(jnp.where(mask, pred, 0.0), axis=1, keepdims=True)
    pred_n = jnp.where(mask, -jnp.inf, pred)                     # removed from softmax
    sim = fnc @ fnc.T
    same = target[:, None] == target[None, :]
    feat = sim * (~same).astype(sim.dtype)
    feat = jnp.where(feat < 1e-6, -jnp.inf, feat)
    logits = jnp.concatenate([pred_p, pred_n, feat], axis=1)
    logp = jax.nn.log_softmax(scale * logits, axis=1)
    return -jnp.mean(logp[:, 0])


if __name__ == "__main__":
    N, D, C = 8, 32, 4
    scale = 32.0

    key = jax.random.PRNGKey(0)
    k1, k2, k3 = jax.random.split(key, 3)
    feature = jax.random.normal(k1, (N, D), dtype=jnp.float32)
    proxy = jax.random.normal(k2, (C, D), dtype=jnp.float32)
    target = jax.random.randint(k3, (N,), 0, C, dtype=jnp.int32)

    # f32 MXU path: checked tightly against the pure-JAX f32 reference.
    loss_f32 = jax.block_until_ready(
        pc_loss_pallas(feature, target, proxy, C, scale, compute_dtype=jnp.float32))
    ref_f32 = pc_loss_ref(feature, target, proxy, scale, matmul_dtype=jnp.float32)
    np.testing.assert_allclose(np.asarray(loss_f32), np.asarray(ref_f32),
                               rtol=1e-4, atol=1e-4)

    # default bf16 MXU path: checked against a reference using bf16 matmul inputs.
    loss_bf16 = jax.block_until_ready(
        pc_loss_pallas(feature, target, proxy, C, scale))
    ref_bf16 = pc_loss_ref(feature, target, proxy, scale, matmul_dtype=jnp.bfloat16)
    assert np.isfinite(np.asarray(loss_bf16))
    np.testing.assert_allclose(np.asarray(loss_bf16), np.asarray(ref_bf16),
                               rtol=5e-3, atol=5e-3)

    print("KERNEL_OK")
</pallas_src>

<mosaic_0001>
module attributes {stable_mosaic.version = 11 : i64} {
  func.func @_pcloss_kernel(%arg0: i32, %arg1: i32, %arg2: memref<8x32xf32, #tpu.memory_space<vmem>>, %arg3: memref<128x32xf32, #tpu.memory_space<vmem>>, %arg4: memref<4x32xf32, #tpu.memory_space<vmem>>, %arg5: memref<8x1xi32, #tpu.memory_space<vmem>>, %arg6: memref<1x128xi32, #tpu.memory_space<vmem>>, %arg7: memref<8x1xf32, #tpu.memory_space<vmem>>, %arg8: memref<8x32xf32, #tpu.memory_space<vmem>>, %arg9: memref<8x1xf32, #tpu.memory_space<vmem>>, %arg10: memref<8x1xf32, #tpu.memory_space<vmem>>, %arg11: memref<8x1xf32, #tpu.memory_space<vmem>>) attributes {dimension_semantics = [#tpu.dimension_semantics<parallel>, #tpu.dimension_semantics<arbitrary>], iteration_bounds = array<i64: 16, 1>, scalar_prefetch = 0 : i64, scratch_operands = 4 : i64, tpu.core_type = #tpu.core_type<tc>, window_params = [{transform_indices = @transform_0, window_bounds = array<i64: 8, 32>}, {transform_indices = @transform_1, window_bounds = array<i64: 128, 32>}, {pipeline_mode = #tpu.pipeline_mode<synchronous>, transform_indices = @transform_2, window_bounds = array<i64: 4, 32>}, {transform_indices = @transform_3, window_bounds = array<i64: 8, 1>}, {transform_indices = @transform_4, window_bounds = array<i64: 1, 128>}, {transform_indices = @transform_5, window_bounds = array<i64: 8, 1>}]} {
    %c0 = arith.constant 0 : index
    %c0_0 = arith.constant 0 : index
    %0 = vector.load %arg5[%c0, %c0_0] : memref<8x1xi32, #tpu.memory_space<vmem>>, vector<8x1xi32>
    %c0_i32 = arith.constant 0 : i32
    %1 = arith.cmpi eq, %arg1, %c0_i32 : i32
    %2 = arith.extui %1 : i1 to i32
    %cst = arith.constant 3.200000e+01 : f32
    %cst_1 = arith.constant 0xFF800000 : f32
    %c0_i32_2 = arith.constant 0 : i32
    %3 = arith.cmpi ne, %2, %c0_i32_2 : i32
    scf.if %3 {
      %c0_29 = arith.constant 0 : index
      %c0_30 = arith.constant 0 : index
      %48 = vector.load %arg2[%c0_29, %c0_30] : memref<8x32xf32, #tpu.memory_space<vmem>>, vector<8x32xf32>
      %49 = arith.mulf %48, %48 : vector<8x32xf32>
      %cst_31 = arith.constant dense<0.000000e+00> : vector<8xf32>
      %50 = vector.multi_reduction <add>, %49, %cst_31 [1] : vector<8x32xf32> to vector<8xf32>
      %51 = vector.shape_cast %50 : vector<8xf32> to vector<8x1xf32>
      %cst_32 = arith.constant 1.000000e-24 : f32
      %52 = vector.broadcast %cst_32 : f32 to vector<8x1xf32>
      %53 = arith.maximumf %51, %52 : vector<8x1xf32>
      %54 = math.rsqrt %53 : vector<8x1xf32>
      %55 = vector.broadcast %54 : vector<8x1xf32> to vector<8x32xf32>
      %56 = arith.mulf %48, %55 : vector<8x32xf32>
      %c0_33 = arith.constant 0 : index
      %c0_34 = arith.constant 0 : index
      %57 = vector.load %arg8[%c0_33, %c0_34] : memref<8x32xf32, #tpu.memory_space<vmem>>, vector<8x32xf32>
      tpu.vector_store %arg8[%c0_33, %c0_34], %56 {strides = array<i32>} : memref<8x32xf32, #tpu.memory_space<vmem>>, vector<8x32xf32>,
      %c0_35 = arith.constant 0 : index
      %c0_36 = arith.constant 0 : index
      %58 = vector.load %arg4[%c0_35, %c0_36] : memref<4x32xf32, #tpu.memory_space<vmem>>, vector<4x32xf32>
      %59 = arith.mulf %58, %58 : vector<4x32xf32>
      %cst_37 = arith.constant dense<0.000000e+00> : vector<4xf32>
      %60 = vector.multi_reduction <add>, %59, %cst_37 [1] : vector<4x32xf32> to vector<4xf32>
      %61 = vector.shape_cast %60 : vector<4xf32> to vector<4x1xf32>
      %cst_38 = arith.constant 1.000000e-24 : f32
      %62 = vector.broadcast %cst_38 : f32 to vector<4x1xf32>
      %63 = arith.maximumf %61, %62 : vector<4x1xf32>
      %64 = math.rsqrt %63 : vector<4x1xf32>
      %65 = vector.broadcast %64 : vector<4x1xf32> to vector<4x32xf32>
      %66 = arith.mulf %58, %65 : vector<4x32xf32>
      %cst_39 = arith.constant dense<0.000000e+00> : vector<8x4xf32>
      %67 = tpu.matmul %56, %66, %cst_39 {dimension_numbers = #tpu.dot_dimension_numbers<[1], [1], [0], [0], [0, 0, 1, 0], [], []>} : vector<8x32xf32>, vector<4x32xf32>, vector<8x4xf32> -> vector<8x4xf32>
      %68 = vector.broadcast %cst : f32 to vector<8x4xf32>
      %69 = arith.mulf %68, %67 : vector<8x4xf32>
      %70 = tpu.iota {dimensions = array<i32: 1>} : vector<8x4xi32>
      %71 = vector.broadcast %0 : vector<8x1xi32> to vector<8x4xi32>
      %72 = arith.cmpi eq, %70, %71 : vector<8x4xi32>
      %cst_40 = arith.constant 0.000000e+00 : f32
      %73 = vector.broadcast %cst_40 : f32 to vector<8x4xf32>
      %74 = arith.select %72, %69, %73 : vector<8x4xi1>, vector<8x4xf32>
      %cst_41 = arith.constant dense<0.000000e+00> : vector<8xf32>
      %75 = vector.multi_reduction <add>, %74, %cst_41 [1] : vector<8x4xf32> to vector<8xf32>
      %76 = vector.shape_cast %75 : vector<8xf32> to vector<8x1xf32>
      %77 = vector.broadcast %cst_1 : f32 to vector<8x4xf32>
      %78 = arith.select %72, %77, %69 : vector<8x4xi1>, vector<8x4xf32>
      %cst_42 = arith.constant dense<0xFF800000> : vector<8xf32>
      %79 = vector.multi_reduction <maximumf>, %78, %cst_42 [1] : vector<8x4xf32> to vector<8xf32>
      %80 = vector.shape_cast %79 : vector<8xf32> to vector<8x1xf32>
      %81 = arith.maximumf %76, %80 : vector<8x1xf32>
      %82 = arith.subf %76, %81 : vector<8x1xf32>
      %83 = math.exp %82 : vector<8x1xf32>
      %84 = vector.broadcast %81 : vector<8x1xf32> to vector<8x4xf32>
      %85 = arith.subf %69, %84 : vector<8x4xf32>
      %86 = math.exp %85 : vector<8x4xf32>
      %cst_43 = arith.constant 0.000000e+00 : f32
      %87 = vector.broadcast %cst_43 : f32 to vector<8x4xf32>
      %88 = arith.select %72, %87, %86 : vector<8x4xi1>, vector<8x4xf32>
      %cst_44 = arith.constant dense<0.000000e+00> : vector<8xf32>
      %89 = vector.multi_reduction <add>, %88, %cst_44 [1] : vector<8x4xf32> to vector<8xf32>
      %90 = vector.shape_cast %89 : vector<8xf32> to vector<8x1xf32>
      %91 = arith.addf %83, %90 : vector<8x1xf32>
      %c0_45 = arith.constant 0 : index
      %c0_46 = arith.constant 0 : index
      %92 = vector.load %arg11[%c0_45, %c0_46] : memref<8x1xf32, #tpu.memory_space<vmem>>, vector<8x1xf32>
      tpu.vector_store %arg11[%c0_45, %c0_46], %76 {strides = array<i32>} : memref<8x1xf32, #tpu.memory_space<vmem>>, vector<8x1xf32>,
      %c0_47 = arith.constant 0 : index
      %c0_48 = arith.constant 0 : index
      %93 = vector.load %arg9[%c0_47, %c0_48] : memref<8x1xf32, #tpu.memory_space<vmem>>, vector<8x1xf32>
      tpu.vector_store %arg9[%c0_47, %c0_48], %81 {strides = array<i32>} : memref<8x1xf32, #tpu.memory_space<vmem>>, vector<8x1xf32>,
      %c0_49 = arith.constant 0 : index
      %c0_50 = arith.constant 0 : index
      %94 = vector.load %arg10[%c0_49, %c0_50] : memref<8x1xf32, #tpu.memory_space<vmem>>, vector<8x1xf32>
      tpu.vector_store %arg10[%c0_49, %c0_50], %91 {strides = array<i32>} : memref<8x1xf32, #tpu.memory_space<vmem>>, vector<8x1xf32>,
    } else {
    }
    %c0_3 = arith.constant 0 : index
    %c0_4 = arith.constant 0 : index
    %4 = vector.load %arg3[%c0_3, %c0_4] : memref<128x32xf32, #tpu.memory_space<vmem>>, vector<128x32xf32>
    %5 = arith.mulf %4, %4 : vector<128x32xf32>
    %cst_5 = arith.constant dense<0.000000e+00> : vector<128xf32>
    %6 = vector.multi_reduction <add>, %5, %cst_5 [1] : vector<128x32xf32> to vector<128xf32>
    %7 = vector.shape_cast %6 : vector<128xf32> to vector<128x1xf32>
    %cst_6 = arith.constant 1.000000e-24 : f32
    %8 = vector.broadcast %cst_6 : f32 to vector<128x1xf32>
    %9 = arith.maximumf %7, %8 : vector<128x1xf32>
    %10 = math.rsqrt %9 : vector<128x1xf32>
    %11 = vector.broadcast %10 : vector<128x1xf32> to vector<128x32xf32>
    %12 = arith.mulf %4, %11 : vector<128x32xf32>
    %c0_7 = arith.constant 0 : index
    %c0_8 = arith.constant 0 : index
    %13 = vector.load %arg8[%c0_7, %c0_8] : memref<8x32xf32, #tpu.memory_space<vmem>>, vector<8x32xf32>
    %cst_9 = arith.constant dense<0.000000e+00> : vector<8x128xf32>
    %14 = tpu.matmul %13, %12, %cst_9 {dimension_numbers = #tpu.dot_dimension_numbers<[1], [1], [0], [0], [0, 0, 1, 0], [], []>} : vector<8x32xf32>, vector<128x32xf32>, vector<8x128xf32> -> vector<8x128xf32>
    %c0_10 = arith.constant 0 : index
    %c0_11 = arith.constant 0 : index
    %15 = vector.load %arg6[%c0_10, %c0_11] : memref<1x128xi32, #tpu.memory_space<vmem>>, vector<1x128xi32>
    %16 = vector.broadcast %0 : vector<8x1xi32> to vector<8x128xi32>
    %17 = vector.broadcast %15 : vector<1x128xi32> to vector<8x128xi32>
    %18 = arith.cmpi eq, %16, %17 : vector<8x128xi32>
    %cst_12 = arith.constant dense<true> : vector<8x128xi1>
    %19 = arith.xori %18, %cst_12 : vector<8x128xi1>
    %cst_13 = arith.constant 9.99999997E-7 : f32
    %20 = vector.broadcast %cst_13 : f32 to vector<8x128xf32>
    %21 = arith.cmpf oge, %14, %20 : vector<8x128xf32>
    %22 = arith.andi %19, %21 : vector<8x128xi1>
    %cst_14 = arith.constant 3.200000e+01 : f32
    %23 = vector.broadcast %cst_14 : f32 to vector<8x128xf32>
    %24 = arith.mulf %23, %14 : vector<8x128xf32>
    %cst_15 = arith.constant 0xFF800000 : f32
    %25 = vector.broadcast %cst_15 : f32 to vector<8x128xf32>
    %26 = arith.select %22, %24, %25 : vector<8x128xi1>, vector<8x128xf32>
    %cst_16 = arith.constant dense<0xFF800000> : vector<8xf32>
    %27 = vector.multi_reduction <maximumf>, %26, %cst_16 [1] : vector<8x128xf32> to vector<8xf32>
    %28 = vector.shape_cast %27 : vector<8xf32> to vector<8x1xf32>
    %c0_17 = arith.constant 0 : index
    %c0_18 = arith.constant 0 : index
    %29 = vector.load %arg9[%c0_17, %c0_18] : memref<8x1xf32, #tpu.memory_space<vmem>>, vector<8x1xf32>
    %30 = arith.maximumf %29, %28 : vector<8x1xf32>
    %31 = vector.broadcast %30 : vector<8x1xf32> to vector<8x128xf32>
    %32 = arith.subf %24, %31 : vector<8x128xf32>
    %33 = math.exp %32 : vector<8x128xf32>
    %cst_19 = arith.constant 0.000000e+00 : f32
    %34 = vector.broadcast %cst_19 : f32 to vector<8x128xf32>
    %35 = arith.select %22, %33, %34 : vector<8x128xi1>, vector<8x128xf32>
    %cst_20 = arith.constant dense<0.000000e+00> : vector<8xf32>
    %36 = vector.multi_reduction <add>, %35, %cst_20 [1] : vector<8x128xf32> to vector<8xf32>
    %37 = vector.shape_cast %36 : vector<8xf32> to vector<8x1xf32>
    %38 = arith.subf %29, %30 : vector<8x1xf32>
    %39 = math.exp %38 : vector<8x1xf32>
    %c0_21 = arith.constant 0 : index
    %c0_22 = arith.constant 0 : index
    %40 = vector.load %arg10[%c0_21, %c0_22] : memref<8x1xf32, #tpu.memory_space<vmem>>, vector<8x1xf32>
    %41 = arith.mulf %39, %40 : vector<8x1xf32>
    %42 = arith.addf %41, %37 : vector<8x1xf32>
    %c0_23 = arith.constant 0 : index
    %c0_24 = arith.constant 0 : index
    %43 = vector.load %arg10[%c0_23, %c0_24] : memref<8x1xf32, #tpu.memory_space<vmem>>, vector<8x1xf32>
    tpu.vector_store %arg10[%c0_23, %c0_24], %42 {strides = array<i32>} : memref<8x1xf32, #tpu.memory_space<vmem>>, vector<8x1xf32>,
    %c0_25 = arith.constant 0 : index
    %c0_26 = arith.constant 0 : index
    %44 = vector.load %arg9[%c0_25, %c0_26] : memref<8x1xf32, #tpu.memory_space<vmem>>, vector<8x1xf32>
    tpu.vector_store %arg9[%c0_25, %c0_26], %30 {strides = array<i32>} : memref<8x1xf32, #tpu.memory_space<vmem>>, vector<8x1xf32>,
    %c0_i32_27 = arith.constant 0 : i32
    %45 = arith.cmpi eq, %arg1, %c0_i32_27 : i32
    %46 = arith.extui %45 : i1 to i32
    %c0_i32_28 = arith.constant 0 : i32
    %47 = arith.cmpi ne, %46, %c0_i32_28 : i32
    scf.if %47 {
      %c0_29 = arith.constant 0 : index
      %c0_30 = arith.constant 0 : index
      %48 = vector.load %arg9[%c0_29, %c0_30] : memref<8x1xf32, #tpu.memory_space<vmem>>, vector<8x1xf32>
      %c0_31 = arith.constant 0 : index
      %c0_32 = arith.constant 0 : index
      %49 = vector.load %arg10[%c0_31, %c0_32] : memref<8x1xf32, #tpu.memory_space<vmem>>, vector<8x1xf32>
      %50 = math.log %49 : vector<8x1xf32>
      %51 = arith.addf %48, %50 : vector<8x1xf32>
      %c0_33 = arith.constant 0 : index
      %c0_34 = arith.constant 0 : index
      %52 = vector.load %arg11[%c0_33, %c0_34] : memref<8x1xf32, #tpu.memory_space<vmem>>, vector<8x1xf32>
      %53 = arith.subf %51, %52 : vector<8x1xf32>
      %c0_35 = arith.constant 0 : index
      %c0_36 = arith.constant 0 : index
      %54 = vector.load %arg7[%c0_35, %c0_36] : memref<8x1xf32, #tpu.memory_space<vmem>>, vector<8x1xf32>
      tpu.vector_store %arg7[%c0_35, %c0_36], %53 {strides = array<i32>} : memref<8x1xf32, #tpu.memory_space<vmem>>, vector<8x1xf32>,
    } else {
    }
    return
  }
  func.func @transform_0(%arg0: i32, %arg1: i32) -> (i32, i32) {
    %c0_i32 = arith.constant 0 : i32
    %c0_i32_0 = arith.constant 0 : i32
    return %arg0, %c0_i32 : i32, i32
  }
  func.func @transform_1(%arg0: i32, %arg1: i32) -> (i32, i32) {
    %c0_i32 = arith.constant 0 : i32
    %c0_i32_0 = arith.constant 0 : i32
    return %arg1, %c0_i32 : i32, i32
  }
  func.func @transform_2(%arg0: i32, %arg1: i32) -> (i32, i32) {
    %c0_i32 = arith.constant 0 : i32
    %c0_i32_0 = arith.constant 0 : i32
    %c0_i32_1 = arith.constant 0 : i32
    return %c0_i32, %c0_i32_0 : i32, i32
  }
  func.func @transform_3(%arg0: i32, %arg1: i32) -> (i32, i32) {
    %c0_i32 = arith.constant 0 : i32
    %c0_i32_0 = arith.constant 0 : i32
    return %arg0, %c0_i32 : i32, i32
  }
  func.func @transform_4(%arg0: i32, %arg1: i32) -> (i32, i32) {
    %c0_i32 = arith.constant 0 : i32
    %c0_i32_0 = arith.constant 0 : i32
    return %c0_i32, %arg1 : i32, i32
  }
  func.func @transform_5(%arg0: i32, %arg1: i32) -> (i32, i32) {
    %c0_i32 = arith.constant 0 : i32
    %c0_i32_0 = arith.constant 0 : i32
    return %arg0, %c0_i32 : i32, i32
  }
}

</mosaic_0001>

<bundles_post_ra>
// kernel: tpu_custom_call.1
= control target key start
LH: loop header
LB: loop body
LE: loop exit
PB: predicated region body
PF: predicated region fallthrough
CT: control target
= control target key end

     0   :  { %s1077_s18 = smov 0   ;;  %s1079_s19 = smov 0   ;;  %s1337_s0 = inlined_call_operand.vmem [shape: f32[128,32], index: 0, kind: input, shape index: {}]   ;;  %s1338_s1 = inlined_call_operand.vmem [shape: f32[128,32], index: 1, kind: input, shape index: {}]   ;;  %s1339_s2 = inlined_call_operand.vmem [shape: f32[4,32], index: 2, kind: input, shape index: {}]   ;;  %s1340_s3 = inlined_call_operand.vmem [shape: s32[128,1], index: 3, kind: input, shape index: {}]   ;;  %s1341_s4 = inlined_call_operand.vmem [shape: s32[1,128], index: 4, kind: input, shape index: {}]   ;;  %s1342_s5 = inlined_call_operand.vmem [shape: f32[128,1], index: 5, kind: output, shape index: {}]  }
   0x1   :  { %s1081_s20 = smov 0  }
   0x2 LB: > { %s27_s21 = sadd.s32 1, %s1036_s19  ;;  %p824_p0 = scmp.ge.s32.totalorder %s1040_s20, 1  ;;  %s1040_s20 = sphi %s1081_s20, %s15_s20   ;;  %s1036_s19 = sphi %s1079_s19, %s1348_s19   ;;  %s1032_s18 = sphi %s1077_s18, %s1347_s18  }
   0x3   : > { %p29_p1 = scmp.ge.s32.totalorder %s27_s21, 16  ;;  %p226_p2 = scmp.lt.s32.totalorder %s1040_s20, 17 }
   0x5   : > { %s1350_s21 = smov (%p29_p1, %s27_s21), 0  ;;  %p227_p3 = pnand %p824_p0, %p226_p2 }
   0x6   : > { %vm292_vm0 = vcmask (!%p227_p3), 261120   ;;  %v1100_v0 = vld [vmem:[%s1338_s1] sm:$0xff] (!%p227_p3)  ;;  %v1105_v1 = vld [vmem:[%s1338_s1 + $0x10] sm:$0xff] (!%p227_p3)  ;;  %v1110_v2 = vld [vmem:[%s1338_s1 + $0x8] sm:$0xff] (!%p227_p3)  ;;  %p264_p4 = scmp.lt.s32.totalorder (!%p227_p3), %s1032_s18, 15  ;;  %vm302_vm1 = vcmask (!%p227_p3), 257024  }
   0x7   : > { %230 = sbr.rel (%p227_p3) target bundleno = 909 (0x38d), region = 40  ;;  %v433_v3 = vmul.f32 (!%p227_p3), %v1100_v0, %v1100_v0  ;;  %v435_v4 = vmul.f32 (!%p227_p3), %v1105_v1, %v1105_v1  ;;  %v434_v5 = vmul.f32 (!%p227_p3), %v1110_v2, %v1110_v2  ;;  %v1121_v6 = vld [vmem:[%s1338_s1 + $0x18] sm:$0xff] (!%p227_p3)  ;;  %v1128_v8 = vld [vmem:[%s1338_s1 + $0x20] sm:$0xff] (!%p227_p3)  ;;  %v1133_v9 = vld [vmem:[%s1338_s1 + $0x28] sm:$0xff] (!%p227_p3)  ;;  %v1042_v54 = vmov (!%p227_p3), 0.0|0.0  }
   0x8   : > { %v436_v7 = vmul.f32 (!%p227_p3), %v1121_v6, %v1121_v6  ;;  %v437_v14 = vmul.f32 (!%p227_p3), %v1128_v8, %v1128_v8  ;;  %v438_v15 = vmul.f32 (!%p227_p3), %v1133_v9, %v1133_v9  ;;  %v1146_v16 = vld [vmem:[%s1338_s1 + $0x30] sm:$0xff] (!%p227_p3)  ;;  %v1151_v17 = vld [vmem:[%s1338_s1 + $0x38] sm:$0xff] (!%p227_p3)  ;;  %v1163_v22 = vld [vmem:[%s1338_s1 + $0x40] sm:$0xff] (!%p227_p3)  ;;  %909 = vmatprep.subr.bf16.mxu1 (!%p227_p3), %v1042_v54  ;;  %v1043_v55 = vmov (!%p227_p3), 0.0  }
   0x9   : > { %v450_v10 = vsel (!%p227_p3), %vm292_vm0, %v433_v3, 0.0  ;;  %v456_v11 = vsel (!%p227_p3), %vm292_vm0, %v435_v4, 0.0  ;;  %v453_v12 = vsel (!%p227_p3), %vm292_vm0, %v434_v5, 0.0  ;;  %v439_v20 = vmul.f32 (!%p227_p3), %v1146_v16, %v1146_v16  ;;  %v1168_v23 = vld [vmem:[%s1338_s1 + $0x48] sm:$0xff] (!%p227_p3)  ;;  %v1180_v28 = vld [vmem:[%s1338_s1 + $0x50] sm:$0xff] (!%p227_p3)  ;;  %v1185_v29 = vld [vmem:[%s1338_s1 + $0x58] sm:$0xff] (!%p227_p3)  ;;  %869 = vmatprep.subr.mxu0 (!%p227_p3), %v1043_v55 }
   0xa   : > { %451 = vadd.xlane.f32.xlu0 (!%p227_p3), %v450_v10  ;;  %457 = vadd.xlane.f32.xlu1 (!%p227_p3), %v456_v11  ;;  %v459_v13 = vsel (!%p227_p3), %vm292_vm0, %v436_v7, 0.0  ;;  %v462_v18 = vsel (!%p227_p3), %vm292_vm0, %v437_v14, 0.0  ;;  %v465_v19 = vsel (!%p227_p3), %vm292_vm0, %v438_v15, 0.0  ;;  %v440_v21 = vmul.f32 (!%p227_p3), %v1151_v17, %v1151_v17  ;;  %v1198_v34 = vld [vmem:[%s1338_s1 + $0x60] sm:$0xff] (!%p227_p3)  ;;  %v1203_v35 = vld [vmem:[%s1338_s1 + $0x68] sm:$0xff] (!%p227_p3)  ;;  %v1231_v46 = vld [vmem:[%s1338_s1 + $0x70] sm:$0xff] (!%p227_p3) }
   0xb   : > { %v468_v24 = vsel (!%p227_p3), %vm292_vm0, %v439_v20, 0.0  ;;  %v441_v26 = vmul.f32 (!%p227_p3), %v1163_v22, %v1163_v22  ;;  %v442_v27 = vmul.f32 (!%p227_p3), %v1168_v23, %v1168_v23  ;;  %v443_v32 = vmul.f32 (!%p227_p3), %v1180_v28, %v1180_v28  ;;  %v1218_v40 = vld [vmem:[%s1339_s2] sm:$0xf] (!%p227_p3)  ;;  %v1236_v47 = vld [vmem:[%s1338_s1 + $0x78] sm:$0xff] (!%p227_p3)  ;;  %vm1254_vm3 = vmpackc.low (!%p227_p3), %vm292_vm0, %vm292_vm0 }
   0xc   : > { %v471_v25 = vsel (!%p227_p3), %vm292_vm0, %v440_v21, 0.0  ;;  %v444_v33 = vmul.f32 (!%p227_p3), %v1185_v29, %v1185_v29  ;;  %v445_v38 = vmul.f32 (!%p227_p3), %v1198_v34, %v1198_v34  ;;  %v446_v39 = vmul.f32 (!%p227_p3), %v1203_v35, %v1203_v35 }
   0xd   : > { %v474_v30 = vsel (!%p227_p3), %vm292_vm0, %v441_v26, 0.0  ;;  %v477_v31 = vsel (!%p227_p3), %vm292_vm0, %v442_v27, 0.0  ;;  %v480_v36 = vsel (!%p227_p3), %vm292_vm0, %v443_v32, 0.0  ;;  %v301_v44 = vmul.f32 (!%p227_p3), %v1218_v40, %v1218_v40 }
   0xe   : > { %454 = vadd.xlane.f32.xlu0 %v453_v12  ;;  %460 = vadd.xlane.f32.xlu1 %v459_v13  ;;  %s1352_s18 = smov (!%p264_p4, %s1032_s18), 15  ;;  %v483_v37 = vsel %vm292_vm0, %v444_v33, 0.0  ;;  %v486_v42 = vsel %vm292_vm0, %v445_v38, 0.0  ;;  %v489_v43 = vsel %vm292_vm0, %v446_v39, 0.0  ;;  %v447_v50 = vmul.f32 %v1231_v46, %v1231_v46 }
   0xf   : > { %s1187_s25 = sshll.u32 %s1352_s18, 3  ;;  %v303_v48 = vsel %vm302_vm1, %v301_v44, 0.0  ;;  %v448_v51 = vmul.f32 %v1236_v47, %v1236_v47  ;;  %vm1044_vm2 = vmmov 0   ;;  %v1045_v56 = vmov 0  }
  0x10   : > { %s267_s6 = scalar_lea.vmem %s1337_s0, %s1187_s25  ;;  %v492_v52 = vsel %vm292_vm0, %v447_v50, 0.0  ;;  %871 = vmatprep.mubr.msk.f32.mxu0 %vm1044_vm2, %v1043_v55  ;;  %906 = vmatprep.mubr.msk.f32.mxu1 %vm1044_vm2, %v1043_v55  ;;  %s277_s15 = scalar_lea.vmem %s1340_s3, %s1187_s25  ;;  %vm393_vm5 = vcmask 31744   ;;  %vm1046_vm7 = vmmov 1   ;;  %vm413_vm11 = vcmask 7168  }
  0x11   : > { %v1220_v41 = vld [vmem:[%s267_s6] sm:$0xff]  ;;  %v495_v53 = vsel %vm292_vm0, %v448_v51, 0.0  ;;  %970 = vset.pattern.permute.xlu0 %v1045_v56  ;;  %971 = vset.pattern.permute.xlu1 %v1045_v56  ;;  %s284_s24 = scalar_lea.vmem %s1342_s5, %s1187_s25 }
  0x12   : > { %463 = vadd.xlane.f32.xlu0 %v462_v18  ;;  %466 = vadd.xlane.f32.xlu1 %v465_v19  ;;  %v291_v45 = vmul.f32 %v1220_v41, %v1220_v41  ;;  %v285_v57 = vld [vmem:[%s277_s15] sm:$0xff] }
  0x14   : > { %v293_v49 = vsel %vm292_vm0, %v291_v45, 0.0 }
  0x16   : > { %469 = vadd.xlane.f32.xlu0 %v468_v24  ;;  %472 = vadd.xlane.f32.xlu1 %v471_v25 }
  0x1a   : > { %475 = vadd.xlane.f32.xlu0 %v474_v30  ;;  %478 = vadd.xlane.f32.xlu1 %v477_v31 }
  0x1e   : > { %481 = vadd.xlane.f32.xlu0 %v480_v36  ;;  %484 = vadd.xlane.f32.xlu1 %v483_v37 }
  0x22   : > { %487 = vadd.xlane.f32.xlu0 %v486_v42  ;;  %490 = vadd.xlane.f32.xlu1 %v489_v43 }
  0x26   : > { %304 = vadd.xlane.f32.xlu0 %v303_v48  ;;  %294 = vadd.xlane.f32.xlu1 %v293_v49 }
  0x2a   : > { %493 = vadd.xlane.f32.xlu0 %v492_v52  ;;  %496 = vadd.xlane.f32.xlu1 %v495_v53 }
  0x3b   : > { %670 = vperm.xlu1 %971, %v285_v57  }
  0x40   : > { %389 = vperm.xlu0 %970, %v285_v57  }
  0x97   : > { %v452_v58 = vpop.xlane.xlu0 %451  ;;  %v458_v59 = vpop.xlane.xlu1 %457 }
  0x98   : > { %v498_v60 = vmax.f32 %v452_v58, 1e-24  ;;  %v500_v3 = vmax.f32 %v458_v59, 1e-24 }
  0x9a   : > { %972 = vrsqrt.f32 %v498_v60 }
  0x9b   : > { %v455_v61 = vpop.xlane.xlu0 %454  ;;  %v461_v62 = vpop.xlane.xlu1 %460 }
  0x9c   : > { %v499_v63 = vmax.f32 %v455_v61, 1e-24  ;;  %v501_v4 = vmax.f32 %v461_v62, 1e-24 }
  0x9e   : > { %974 = vrsqrt.f32 %v499_v63 }
  0x9f   : > { %v464_v5 = vpop.xlane.xlu0 %463  ;;  %v467_v7 = vpop.xlane.xlu1 %466  ;;  %976 = vrsqrt.f32 %v500_v3 }
  0xa0   : > { %978 = vrsqrt.f32 %v501_v4  ;;  %v502_v10 = vmax.f32 %v464_v5, 1e-24  ;;  %v503_v13 = vmax.f32 %v467_v7, 1e-24 }
  0xa2   : > { %980 = vrsqrt.f32 %v502_v10 }
  0xa3   : > { %v470_v11 = vpop.xlane.xlu0 %469  ;;  %v473_v12 = vpop.xlane.xlu1 %472  ;;  %982 = vrsqrt.f32 %v503_v13 }
  0xa4   : > { %v973_v14 = vpop.eup %972  ;;  %v504_v26 = vmax.f32 %v470_v11, 1e-24  ;;  %v505_v33 = vmax.f32 %v473_v12, 1e-24 }
  0xa5   : > { %v530_v20 = vmul.f32 %v973_v14, %v1100_v0 }
  0xa6   : > { %984 = vrsqrt.f32 %v504_v26 }
  0xa7   : > { %v476_v15 = vpop.xlane.xlu0 %475  ;;  %v479_v18 = vpop.xlane.xlu1 %478  ;;  %986 = vrsqrt.f32 %v505_v33 }
  0xa8   : > { %v975_v19 = vpop.eup %974  ;;  %v506_v39 = vmax.f32 %v476_v15, 1e-24  ;;  %v507_v48 = vmax.f32 %v479_v18, 1e-24 }
  0xa9   : > { %v531_v21 = vmul.f32 %v975_v19, %v1110_v2  ;;  %v977_v25 = vpop.eup %976 }
  0xaa   : > { %v979_v32 = vpop.eup %978  ;;  %v532_v36 = vmul.f32 %v977_v25, %v1105_v1  ;;  %988 = vrsqrt.f32 %v506_v39 }
  0xab   : > { %v482_v27 = vpop.xlane.xlu0 %481  ;;  %v910_v30 = vpack.c.bf16 %v531_v21, %v530_v20  ;;  %v485_v31 = vpop.xlane.xlu1 %484  ;;  %v533_v37 = vmul.f32 %v979_v32, %v1121_v6 }
  0xac   : > { %v981_v38 = vpop.eup %980  ;;  %v508_v55 = vmax.f32 %v482_v27, 1e-24  ;;  %v509_v56 = vmax.f32 %v485_v31, 1e-24 }
  0xad   : > { %912 = vmatpush3.bf16.xpose.msk.msra.mxu1 %vm1254_vm3, %v910_v30  ;;  %v983_v42 = vpop.eup %982  ;;  %v914_v44 = vpack.c.bf16 %v533_v37, %v532_v36  ;;  %v534_v51 = vmul.f32 %v981_v38, %v1128_v8 }
  0xae   : > { %913 = vmatprep.subr.bf16.mxu1 %v1042_v54  ;;  %v535_v1 = vmul.f32 %v983_v42, %v1133_v9 }
  0xaf   : > { %v488_v0 = vpop.xlane.xlu0 %487  ;;  %v491_v2 = vpop.xlane.xlu1 %490 }
  0xb0   : > { %v985_v6 = vpop.eup %984  ;;  %v918_v52 = vpack.c.bf16 %v535_v1, %v534_v51  ;;  %v510_v3 = vmax.f32 %v488_v0, 1e-24  ;;  %v511_v4 = vmax.f32 %v491_v2, 1e-24  ;;  %v847_v0 = vld [vmem:[%s1341_s4] ss:$0 sm:$0xff] }
  0xb1   : > { %v987_v53 = vpop.eup %986  ;;  %v536_v57 = vmul.f32 %v985_v6, %v1146_v16 }
  0xb2   : > { %v537_v58 = vmul.f32 %v987_v53, %v1151_v17 }
  0xb3   : > { %v305_v43 = vpop.xlane.xlu0 %304  ;;  %v295_v45 = vpop.xlane.xlu1 %294 }
  0xb4   : > { %v306_v49 = vmax.f32 %v305_v43, 1e-24  ;;  %v296_v50 = vmax.f32 %v295_v45, 1e-24  ;;  %v989_v8 = vpop.eup %988  ;;  %v922_v61 = vpack.c.bf16 %v537_v58, %v536_v57 }
  0xb5   : > { %916 = vmatpush3.bf16.xpose.msk.msra.mxu1 %vm1254_vm3, %v914_v44  ;;  %v538_v16 = vmul.f32 %v989_v8, %v1163_v22 }
  0xb6   : > { %990 = vrsqrt.f32 %v306_v49  ;;  %917 = vmatprep.subr.bf16.mxu1 %v1042_v54 }
  0xb7   : > { %992 = vrsqrt.f32 %v296_v50  ;;  %v497_v7 = vpop.xlane.xlu1 %496 }
  0xb8   : > { %994 = vrsqrt.f32 %v507_v48  ;;  %v513_v12 = vmax.f32 %v497_v7, 1e-24 }
  0xb9   : > { %996 = vrsqrt.f32 %v508_v55 }
  0xba   : > { %998 = vrsqrt.f32 %v509_v56 }
  0xbb   : > { %1000 = vrsqrt.f32 %v510_v3  ;;  %v671_v2 = vpop.permute.xlu1 %670 }
  0xbc   : > { %1002 = vrsqrt.f32 %v511_v4  ;;  %vm676_vm6 = vcmp.eq.s32.totalorder %v671_v2, %v847_v0 }
  0xbd   : > { %920 = vmatpush3.bf16.xpose.msk.msra.mxu1 %vm1254_vm3, %v918_v52  ;;  %vm677_vm8 = vmxor %vm676_vm6, %vm1046_vm7 }
  0xbe   : > { %921 = vmatprep.subr.bf16.mxu1 %v1042_v54 }
  0xc0   : > { %v991_v9 = vpop.eup %990 }
  0xc1   : > { %v993_v59 = vpop.eup %992  ;;  %v308_v60 = vmul.f32 %v991_v9, %v1218_v40  ;;  %v494_v40 = vpop.xlane.xlu0 %493 }
  0xc2   : > { %v995_v62 = vpop.eup %994  ;;  %v298_v63 = vmul.f32 %v993_v59, %v1220_v41  ;;  %v512_v11 = vmax.f32 %v494_v40, 1e-24 }
  0xc3   : > { %870 = vmatpush3.xpose.msk.msra.mxu0 %vm292_vm0, %v308_v60  ;;  %v539_v17 = vmul.f32 %v995_v62, %v1168_v23  ;;  %v997_v41 = vpop.eup %996 }
  0xc4   : > { %299 = vst.msk [vmem:[#allocation2] sm:$0xff] %vm292_vm0, %v298_v63  ;;  %v999_v10 = vpop.eup %998  ;;  %v540_v22 = vmul.f32 %v997_v41, %v1180_v28  ;;  %1004 = vrsqrt.f32 %v512_v11 }
  0xc5   : > { %924 = vmatpush3.bf16.xpose.msk.msra.mxu1 %vm1254_vm3, %v922_v61  ;;  %v926_v5 = vpack.c.bf16 %v539_v17, %v538_v16  ;;  %v541_v23 = vmul.f32 %v999_v10, %v1185_v29  ;;  %1006 = vrsqrt.f32 %v513_v12  ;;  %v1001_v13 = vpop.eup %1000  ;;  %v390_v30 = vpop.permute.xlu0 %389 }
  0xc6   : > { %872 = vmatmul.mubr.msk.f32.vlgmr.msra.gmra.mrb[0].mxu0 %vm292_vm0, %v298_v63  ;;  %925 = vmatprep.subr.bf16.mxu1 %v1042_v54  ;;  %v1003_v15 = vpop.eup %1002  ;;  %v542_v18 = vmul.f32 %v1001_v13, %v1198_v34 }
  0xc7   : > { %v930_v14 = vpack.c.bf16 %v541_v23, %v540_v22  ;;  %v543_v19 = vmul.f32 %v1003_v15, %v1203_v35  ;;  %v386_v35 = vlaneseq }
  0xc9   : > { %v934_v28 = vpack.c.bf16 %v543_v19, %v542_v18  ;;  %v387_v27 = vand.u32 127, %v386_v35 }
  0xcb   : > { %v546_v34 = vld [vmem:[#allocation2] sm:$0xff]  ;;  %vm391_vm4 = vcmp.eq.s32.totalorder %v387_v27, %v390_v30 }
  0xcd   : > { %928 = vmatpush3.bf16.xpose.msk.msra.mxu1 %vm1254_vm3, %v926_v5 }
  0xce   : > { %929 = vmatprep.subr.bf16.mxu1 %v1042_v54  ;;  %v1005_v20 = vpop.eup %1004 }
  0xcf   : > { %v1007_v21 = vpop.eup %1006  ;;  %v544_v29 = vmul.f32 %v1005_v20, %v1231_v46 }
  0xd0   : > { %v545_v25 = vmul.f32 %v1007_v21, %v1236_v47 }
  0xd2   : > { %v938_v26 = vpack.c.bf16 %v545_v25, %v544_v29 }
  0xd5   : > { %932 = vmatpush3.bf16.xpose.msk.msra.mxu1 %vm1254_vm3, %v930_v14 }
  0xd6   : > { %933 = vmatprep.subr.bf16.mxu1 %v1042_v54 }
  0xdd   : > { %936 = vmatpush3.bf16.xpose.msk.msra.mxu1 %vm1254_vm3, %v934_v28 }
  0xde   : > { %937 = vmatprep.subr.bf16.mxu1 %v1042_v54 }
  0xe5   : > { %940 = vmatpush3.bf16.xpose.msk.msra.mxu1 %vm1254_vm3, %v938_v26 }
  0xec   : > { %907 = vmatmul.mubr.msk.f32.vlgmr.msra.gmra.mrb[0].mxu1 %vm292_vm0, %v546_v34 }
 0x199   : > { %v381_v31 = vpop.f32.mrb[0].mxu0 }
 0x19a   : > { %v385_v32 = vmul.f32 32.0, %v381_v31  ;;  %v873_v33 = vpop.f32.mrb[1].mxu0 }
 0x19c   : > { %v397_v46 = vsel %vm391_vm4, -inf, %v385_v32  ;;  %v392_v47 = vsel %vm391_vm4, %v385_v32, 0.0 }
 0x19d   : > { %v398_v54 = vsel %vm393_vm5, %v397_v46, -inf  ;;  %v394_v24 = vsel %vm393_vm5, %v392_v47, 0.0 }
 0x19e   : > { %399 = vmax.xlane.f32.xlu0 %v398_v54  ;;  %395 = vadd.xlane.f32.xlu1 %v394_v24 }
 0x1bf   : > { %v664_v36 = vpop.f32.mrb[0].mxu1 }
 0x1c0   : > { %vm678_vm9 = vcmp.ge.f32.partialorder %v664_v36, 1e-06  ;;  %v680_v37 = vmul.f32 32.0, %v664_v36  ;;  %v908_v38 = vpop.f32.mrb[1].mxu1 }
 0x1c1   : > { %vm1308_vm10 = vmand %vm677_vm8, %vm678_vm9 }
 0x1c2   : > { %v681_v42 = vsel %vm1308_vm10, %v680_v37, -inf }
 0x1c3   : > { %682 = vmax.xlane.f32.xlu1 %v681_v42 }
 0x22b   : > { %v400_v43 = vpop.xlane.xlu0 %399  ;;  %v396_v44 = vpop.xlane.xlu1 %395 }
 0x22c   : > { %v401_v45 = vmax.f32 %v396_v44, %v400_v43  ;;  %414 = vst.msk [vmem:[#allocation5] sm:$0xff] %vm413_vm11, %v396_v44 }
 0x22e   : > { %v402_v48 = vsub.f32 %v396_v44, %v401_v45  ;;  %415 = vst.msk [vmem:[#allocation3] sm:$0xff] %vm413_vm11, %v401_v45  ;;  %v405_v6 = vsub.f32 %v385_v32, %v401_v45 }
 0x230   : > { %v406_v52 = vmul.f32 1.442695, %v405_v6  ;;  %v403_v60 = vmul.f32 1.442695, %v402_v48 }
 0x232   : > { %1008 = vpow2.f32 %v406_v52 }
 0x233   : > { %v714_v22 = vld [vmem:[#allocation5] sm:$0xff] }
 0x235   : > { %v684_v49 = vld [vmem:[#allocation3] sm:$0xff] }
 0x23c   : > { %v1009_v53 = vpop.eup %1008 }
 0x23d   : > { %v408_v55 = vsel %vm391_vm4, 0.0, %v1009_v53 }
 0x23e   : > { %v409_v56 = vsel %vm393_vm5, %v408_v55, 0.0 }
 0x250   : > { %v683_v50 = vpop.xlane.xlu1 %682 }
 0x251   : > { %v685_v51 = vmax.f32 %v684_v49, %v683_v50 }
 0x253   : > { %v697_v1 = vsub.f32 %v684_v49, %v685_v51  ;;  %705 = vst.msk [vmem:[#allocation3] sm:$0xff] %vm413_vm11, %v685_v51  ;;  %688 = vperm.xlu1 %971, %v685_v51  }
 0x255   : > { %v698_v3 = vmul.f32 1.442695, %v697_v1 }
 0x25a   : > { %v709_v11 = vld [vmem:[#allocation3] sm:$0xff] }
 0x277   : > { %410 = vadd.xlane.f32.xlu1 %v409_v56 }
 0x2d2   : > { %v689_v57 = vpop.permute.xlu1 %688 }
 0x2d3   : > { %v691_v58 = vsub.f32 %v680_v37, %v689_v57 }
 0x2d5   : > { %v692_v8 = vmul.f32 1.442695, %v691_v58 }
 0x2d7   : > { %1010 = vpow2.f32 %v692_v8 }
 0x2d8   : > { %1012 = vpow2.f32 %v403_v60 }
 0x2d9   : > { %1014 = vpow2.f32 %v698_v3 }
 0x2e1   : > { %v1011_v9 = vpop.eup %1010 }
 0x2e2   : > { %v694_v59 = vsel %vm1308_vm10, %v1011_v9, 0.0  ;;  %v1013_v61 = vpop.eup %1012 }
 0x2e3   : > { %695 = vadd.xlane.f32.xlu0 %v694_v59  ;;  %v1015_v16 = vpop.eup %1014 }
 0x304   : > { %v411_v62 = vpop.xlane.xlu1 %410 }
 0x305   : > { %v412_v63 = vadd.f32 %v1013_v61, %v411_v62 }
 0x307   : > { %416 = vst.msk [vmem:[#allocation4] sm:$0xff] %vm413_vm11, %v412_v63 }
 0x30e   : > { %v700_v4 = vld [vmem:[#allocation4] sm:$0xff] }
 0x30f   : > { %v701_v17 = vmul.f32 %v1015_v16, %v700_v4 }
 0x370   : > { %v696_v40 = vpop.xlane.xlu0 %695 }
 0x371   : > { %v702_v41 = vadd.f32 %v701_v17, %v696_v40 }
 0x373   : > { %704 = vst.msk [vmem:[#allocation4] sm:$0xff] %vm413_vm11, %v702_v41 }
 0x37a   : > { %v710_v5 = vld [vmem:[#allocation4] sm:$0xff] }
 0x37b   : > { %1016 = vlog2.f32 %v710_v5 }
 0x385   : > { %v1017_v7 = vpop.eup %1016 }
 0x386   : > { %v712_v10 = vmul.f32 0.6931472, %v1017_v7 }
 0x388   : > { %v713_v12 = vadd.f32 %v712_v10, %v709_v11 }
 0x38a   : > { %v715_v23 = vsub.f32 %v713_v12, %v714_v22 }
 0x38c   : > { %716 = vst.msk [vmem:[%s284_s24] sm:$0xff] %vm413_vm11, %v715_v23 }
 0x38d PF: > { %s15_s20 = sadd.s32 1, %s1040_s20   ;;  %s1347_s18 = smov %s1036_s19 }
 0x38e   : > { %p12_p5 = scmp.ge.s32.totalorder %s15_s20, 18   ;;  %s1348_s19 = smov %s1350_s21 }
 0x390   :  { %14 = sbr.rel (!%p12_p5) target bundleno = 2 (0x2), region = 87 }

</bundles_post_ra>
